<compile_context>
chip_gen: v7x
topology: tpu7x:2x2x1
jax: 0.10.0
libtpu: 0.0.40
codegen_flags: <defaults>
</compile_context>

<pallas_src>
import jax
import jax.numpy as jnp
from jax import lax
from jax.experimental import pallas as pl
from jax.experimental.pallas import tpu as pltpu

POOL_K = 7      # AvgPool2d kernel size (stride=1, no padding needed at 12x12)
LANE = 128      # pad num_classes up to a full lane width
SUBLANE = 8     # pad batch up to full sublanes


# ----------------------------------------------------------------------------- 
# Init-time weight folding: fold avgpool(7,s=1) + flatten into the FC weight.
#   y[n,k] = sum_{c,i,j} fc_w[k, c*Ho*Wo + i*Wo + j] * mean_{7x7 window at (i,j)} x
#          = sum_{c,p,q} x[n,c,p,q] * W_eff[k, c*H*W + p*W + q]
# -----------------------------------------------------------------------------
def fold_pool_into_fc(fc_w, C, H, W, pool_k=POOL_K):
    num_classes, num_feats = fc_w.shape
    Ho, Wo = H - (pool_k - 1), W - (pool_k - 1)
    assert num_feats == C * Ho * Wo
    w4 = fc_w.reshape(num_classes, C, Ho, Wo) * (1.0 / float(pool_k * pool_k))
    w_eff = jnp.zeros((num_classes, C, H, W), fc_w.dtype)
    for dh in range(pool_k):
        for dw in range(pool_k):
            w_eff = w_eff.at[:, :, dh:dh + Ho, dw:dw + Wo].add(w4)
    return w_eff.reshape(num_classes, C * H * W)


def pad_params(w_eff, fc_b, lane=LANE):
    """Pad num_classes up to a multiple of 128 lanes (done once at init)."""
    num_classes = w_eff.shape[0]
    np_ = ((num_classes + lane - 1) // lane) * lane
    w_pad = jnp.pad(w_eff, ((0, np_ - num_classes), (0, 0)))
    b_pad = jnp.pad(fc_b, (0, np_ - num_classes)).reshape(1, np_)
    return w_pad, b_pad


# -----------------------------------------------------------------------------
# Fused kernel: one MXU pass, f32 accumulation, dense (Nb, NP) stores.
# -----------------------------------------------------------------------------
def fused_fc_kernel(x_ref, w_ref, b_ref, o_ref):
    # x_ref: (Nb, F)   w_ref: (NP, F)   b_ref: (1, NP)   o_ref: (Nb, NP)
    y = lax.dot_general(
        x_ref[...], w_ref[...],
        dimension_numbers=(((1,), (1,)), ((), ())),   # contract on F; MXU handles W.T
        preferred_element_type=jnp.float32)
    o_ref[...] = (y + b_ref[...].astype(jnp.float32)).astype(o_ref.dtype)


def linear_decoder_forward(scale32, w_eff_pad, b_pad, num_classes):
    """scale32: (N, C, H, W).  w_eff_pad: (NP, C*H*W).  b_pad: (1, NP)."""
    N, C, H, W = scale32.shape
    F = C * H * W
    NP = w_eff_pad.shape[0]

    # Flatten NCHW (row-major, matches PyTorch .view) -- cheap contiguous reshape.
    x = scale32.reshape(N, F).astype(jnp.float32)

    # Pad batch to full sublanes (and to the batch tile) so stores are unmasked.
    Nb = SUBLANE if N <= SUBLANE else 128
    n_pad = ((N + Nb - 1) // Nb) * Nb
    if n_pad != N:
        x = jnp.pad(x, ((0, n_pad - N), (0, 0)))

    out = pl.pallas_call(
        fused_fc_kernel,
        out_shape=jax.ShapeDtypeStruct((n_pad, NP), jnp.float32),
        grid=(n_pad // Nb,),
        in_specs=[
            pl.BlockSpec((Nb, F), lambda i: (i, 0)),     # batch tile of activations
            pl.BlockSpec((NP, F), lambda i: (0, 0)),     # folded weight, resident
            pl.BlockSpec((1, NP), lambda i: (0, 0)),     # bias (single vreg tile)
        ],
        out_specs=pl.BlockSpec((Nb, NP), lambda i: (i, 0)),
        compiler_params=pltpu.CompilerParams(
            dimension_semantics=("parallel",)),          # shards over TCs when N grows
    )(x, w_eff_pad, b_pad)

    return out[:N, :num_classes].astype(scale32.dtype)


# -----------------------------------------------------------------------------
# Pure-JAX reference matching the PyTorch forward (drop=None).
# -----------------------------------------------------------------------------
def reference_forward(scale32, fc_w, fc_b):
    N, C, H, W = scale32.shape
    Ho, Wo = H - (POOL_K - 1), W - (POOL_K - 1)
    windows = jnp.stack(
        [scale32[:, :, dh:dh + Ho, dw:dw + Wo]
         for dh in range(POOL_K) for dw in range(POOL_K)], axis=0)
    pooled = jnp.mean(windows, axis=0)
    x = pooled.reshape(N, -1)
    return x @ fc_w.T + fc_b


if __name__ == "__main__":
    key = jax.random.PRNGKey(0)
    k_x, k_w, k_b = jax.random.split(key, 3)

    N, C, H, W = 2, 4, 12, 12              # scale32 feature map (NCHW)
    num_classes = 10
    Ho, Wo = H - (POOL_K - 1), W - (POOL_K - 1)
    num_feats = C * Ho * Wo                # 4 * 6 * 6 = 144

    scale32 = jax.random.normal(k_x, (N, C, H, W), dtype=jnp.float32)
    fc_w = 0.05 * jax.random.normal(k_w, (num_classes, num_feats), dtype=jnp.float32)
    fc_b = 0.01 * jax.random.normal(k_b, (num_classes,), dtype=jnp.float32)

    # --- init time (once): fold pool+flatten into the FC weight, pad to lanes ---
    w_eff = fold_pool_into_fc(fc_w, C, H, W)          # (10, 576)
    w_pad, b_pad = pad_params(w_eff, fc_b)            # (128, 576), (1, 128)

    fwd = jax.jit(lambda x: linear_decoder_forward(x, w_pad, b_pad, num_classes))
    out = jax.block_until_ready(fwd(scale32))
    ref = reference_forward(scale32, fc_w, fc_b)

    assert out.shape == (N, num_classes)
    assert jnp.allclose(out, ref, atol=1e-4, rtol=1e-4)
    # TODO(synk): Dropout2d path is treated as disabled (conf['decoder']['dropout']=False / eval mode).
    # Note: operands kept f32; on v6e/v7x a bf16 cast of x/w (f32 accum) would halve DMA bytes
    # if batch grows, at the cost of ~1e-3 relative error on this 576-deep reduction.
    print("KERNEL_OK")
</pallas_src>

<mosaic_0001>
module attributes {stable_mosaic.version = 11 : i64} {
  func.func @fused_fc_kernel(%arg0: i32, %arg1: memref<8x576xf32, #tpu.memory_space<vmem>>, %arg2: memref<128x576xf32, #tpu.memory_space<vmem>>, %arg3: memref<1x128xf32, #tpu.memory_space<vmem>>, %arg4: memref<8x128xf32, #tpu.memory_space<vmem>>) attributes {dimension_semantics = [#tpu.dimension_semantics<parallel>], iteration_bounds = array<i64: 1>, scalar_prefetch = 0 : i64, scratch_operands = 0 : i64, tpu.core_type = #tpu.core_type<tc>, window_params = [{transform_indices = @transform_0, window_bounds = array<i64: 8, 576>}, {pipeline_mode = #tpu.pipeline_mode<synchronous>, transform_indices = @transform_1, window_bounds = array<i64: 128, 576>}, {pipeline_mode = #tpu.pipeline_mode<synchronous>, transform_indices = @transform_2, window_bounds = array<i64: 1, 128>}, {transform_indices = @transform_3, window_bounds = array<i64: 8, 128>}]} {
    %c0 = arith.constant 0 : index
    %c0_0 = arith.constant 0 : index
    %0 = vector.load %arg1[%c0, %c0_0] : memref<8x576xf32, #tpu.memory_space<vmem>>, vector<8x576xf32>
    %c0_1 = arith.constant 0 : index
    %c0_2 = arith.constant 0 : index
    %1 = vector.load %arg2[%c0_1, %c0_2] : memref<128x576xf32, #tpu.memory_space<vmem>>, vector<128x576xf32>
    %cst = arith.constant dense<0.000000e+00> : vector<8x128xf32>
    %2 = tpu.matmul %0, %1, %cst {dimension_numbers = #tpu.dot_dimension_numbers<[1], [1], [0], [0], [0, 0, 1, 0], [], []>} : vector<8x576xf32>, vector<128x576xf32>, vector<8x128xf32> -> vector<8x128xf32>
    %c0_3 = arith.constant 0 : index
    %c0_4 = arith.constant 0 : index
    %3 = vector.load %arg3[%c0_3, %c0_4] : memref<1x128xf32, #tpu.memory_space<vmem>>, vector<1x128xf32>
    %4 = vector.broadcast %3 : vector<1x128xf32> to vector<8x128xf32>
    %5 = arith.addf %2, %4 : vector<8x128xf32>
    %c0_5 = arith.constant 0 : index
    %c0_6 = arith.constant 0 : index
    %6 = vector.load %arg4[%c0_5, %c0_6] : memref<8x128xf32, #tpu.memory_space<vmem>>, vector<8x128xf32>
    tpu.vector_store %arg4[%c0_5, %c0_6], %5 {strides = array<i32>} : memref<8x128xf32, #tpu.memory_space<vmem>>, vector<8x128xf32>,
    return
  }
  func.func @transform_0(%arg0: i32) -> (i32, i32) {
    %c0_i32 = arith.constant 0 : i32
    %c0_i32_0 = arith.constant 0 : i32
    return %arg0, %c0_i32 : i32, i32
  }
  func.func @transform_1(%arg0: i32) -> (i32, i32) {
    %c0_i32 = arith.constant 0 : i32
    %c0_i32_0 = arith.constant 0 : i32
    %c0_i32_1 = arith.constant 0 : i32
    return %c0_i32, %c0_i32_0 : i32, i32
  }
  func.func @transform_2(%arg0: i32) -> (i32, i32) {
    %c0_i32 = arith.constant 0 : i32
    %c0_i32_0 = arith.constant 0 : i32
    %c0_i32_1 = arith.constant 0 : i32
    return %c0_i32, %c0_i32_0 : i32, i32
  }
  func.func @transform_3(%arg0: i32) -> (i32, i32) {
    %c0_i32 = arith.constant 0 : i32
    %c0_i32_0 = arith.constant 0 : i32
    return %arg0, %c0_i32 : i32, i32
  }
}

</mosaic_0001>

<bundles_post_ra>
// kernel: _lambda_.1
= control target key start
LH: loop header
LB: loop body
LE: loop exit
PB: predicated region body
PF: predicated region fallthrough
CT: control target
= control target key end

     0   :  { %8 = vsyncpa [#allocation3], 0  ;;  %s588_s12 = smov [#allocation2]   ;;  %s670_s0 = inlined_call_operand.vmem [shape: f32[8,576], index: 0, kind: input, shape index: {}]   ;;  %s671_s1 = inlined_call_operand.hbm [shape: f32[128,576], index: 1, kind: input, shape index: {}]   ;;  %s672_s2 = inlined_call_operand.vmem [shape: f32[1,128], index: 2, kind: input, shape index: {}]   ;;  %s673_s3 = inlined_call_operand.vmem [shape: f32[8,128], index: 3, kind: output, shape index: {}]  }
   0x1   :  { %s16_s13 = sshll.u32 %s588_s12, 4  ;;  %s564_s16 = scalar_lea.hbm %s671_s1, 10240  ;;  %s17_s13 = int_to_ptr.vmem [resolvable:$true] %s16_s13 }
   0x2   :  { %p565_p0 = scmp.ne.s32.totalorder %s671_s1, %s564_s16  ;;  %p568_p1 = scmp.lt.u32.totalorder %s564_s16, %s671_s1 }
   0x4   :  { %p570_p2 = pnand %p568_p1, %p565_p0 }
   0x6   :  { %573 = shalt.err (!%p570_p2)
}
   0x7   :  { %s574_s21 = scalar_lea.vmem %s17_s13, 10240  ;;  %p579_p4 = scmp.lt.s32.totalorder %s17_s13, %s17_s13 }
   0x8   :  { %p575_p3 = scmp.ne.s32.totalorder %s17_s13, %s574_s21  ;;  %p580_p5 = scmp.lt.s32.totalorder %s574_s21, %s574_s21 }
   0xa   :  { %p581_p6 = por %p580_p5, %p579_p4 }
   0xc   :  { %p582_p7 = pnand %p581_p6, %p575_p3 }
   0xe   :  { %585 = shalt.err (!%p582_p7)
}
   0xf   :  { %s589_s22 = smov 640   ;;  %s590_s23 = smov 40  }
  0x10   :  { %22 = dma.hbm_to_vmem [thread:$0]  %s671_s1, 10240, %s17_s13, [#allocation3], %s589_s22, %s589_s22, %s590_s23  }
  0x11   :  { %586 = dma.done.wait [#allocation3], 10240  }
  0x12   :  { %587 = vsyncadd [#allocation3], 4294957056  ;;  %v36_v0 = vld [vmem:[#allocation2 + $0x18] sm:$0xff]  ;;  %v41_v1 = vld [vmem:[#allocation2 + $0x40] sm:$0xff]  ;;  %vm120_vm0 = vcmask 523264   ;;  %vm592_vm2 = vmmov 0  }
  0x13   :  { %v35_v2 = vld [vmem:[#allocation2 + $0x10] sm:$0xff]  ;;  %v490_v3 = vpack.c.bf16 %v41_v1, %v36_v0  ;;  %v40_v4 = vld [vmem:[#allocation2 + $0x38] sm:$0xff]  ;;  %v46_v5 = vld [vmem:[#allocation2 + $0x68] sm:$0xff] }
  0x14   :  { %v51_v6 = vld [vmem:[#allocation2 + $0x90] sm:$0xff]  ;;  %v492_v7 = vpack.c.bf16 %v40_v4, %v35_v2  ;;  %v45_v9 = vld [vmem:[#allocation2 + $0x60] sm:$0xff]  ;;  %v50_v10 = vld [vmem:[#allocation2 + $0x88] sm:$0xff] }
  0x15   :  { %v494_v8 = vpack.c.bf16 %v51_v6, %v46_v5  ;;  %491 = vmatprep.subr.bf16.mxu0 %v490_v3  ;;  %v56_v11 = vld [vmem:[#allocation2 + $0xb8] sm:$0xff]  ;;  %v61_v12 = vld [vmem:[#allocation2 + $0xe0] sm:$0xff]  ;;  %v496_v13 = vpack.c.bf16 %v50_v10, %v45_v9  ;;  %v34_v15 = vld [vmem:[#allocation2 + $0x8] sm:$0xff] }
  0x16   :  { %493 = vmatpush1.bf16.xpose.msra.mxu0 %v492_v7  ;;  %v498_v14 = vpack.c.bf16 %v61_v12, %v56_v11  ;;  %v39_v16 = vld [vmem:[#allocation2 + $0x30] sm:$0xff]  ;;  %v33_v17 = vld [vmem:[#allocation2] sm:$0xff]  ;;  %v38_v18 = vld [vmem:[#allocation2 + $0x28] sm:$0xff] }
  0x17   :  { %495 = vmatprep.subr.bf16.mxu0 %v494_v8  ;;  %v55_v19 = vld [vmem:[#allocation2 + $0xb0] sm:$0xff]  ;;  %v458_v20 = vpack.c.bf16 %v39_v16, %v34_v15  ;;  %v460_v21 = vpack.c.bf16 %v38_v18, %v33_v17  ;;  %v31_v22 = vld [vmem:[%s670_s0 + $0x18] sm:$0xff]  ;;  %v49_v25 = vld [vmem:[#allocation2 + $0x80] sm:$0xff] }
  0x18   :  { %v60_v23 = vld [vmem:[#allocation2 + $0xd8] sm:$0xff]  ;;  %306 = vmatprep.mubr.f32.mxu0 %v31_v22  ;;  %v66_v26 = vld [vmem:[#allocation2 + $0x108] sm:$0xff]  ;;  %v71_v27 = vld [vmem:[#allocation2 + $0x130] sm:$0xff] }
  0x19   :  { %v44_v24 = vld [vmem:[#allocation2 + $0x58] sm:$0xff]  ;;  %459 = vmatprep.subr.bf16.mxu1 %v458_v20  ;;  %v500_v29 = vpack.c.bf16 %v60_v23, %v55_v19  ;;  %v43_v30 = vld [vmem:[#allocation2 + $0x50] sm:$0xff]  ;;  %v502_v32 = vpack.c.bf16 %v71_v27, %v66_v26  ;;  %v54_v33 = vld [vmem:[#allocation2 + $0xa8] sm:$0xff] }
  0x1a   :  { %v462_v28 = vpack.c.bf16 %v49_v25, %v44_v24  ;;  %461 = vmatpush1.bf16.xpose.msra.mxu1 %v460_v21  ;;  %v48_v31 = vld [vmem:[#allocation2 + $0x78] sm:$0xff]  ;;  %v59_v34 = vld [vmem:[#allocation2 + $0xd0] sm:$0xff]  ;;  %v65_v37 = vld [vmem:[#allocation2 + $0x100] sm:$0xff] }
  0x1b   :  { %v464_v35 = vpack.c.bf16 %v48_v31, %v43_v30  ;;  %v466_v36 = vpack.c.bf16 %v59_v34, %v54_v33  ;;  %v70_v38 = vld [vmem:[#allocation2 + $0x128] sm:$0xff]  ;;  %v76_v39 = vld [vmem:[#allocation2 + $0x158] sm:$0xff]  ;;  %v81_v40 = vld [vmem:[#allocation2 + $0x180] sm:$0xff]  ;;  %v591_v31 = vmov 0.0|0.0  }
  0x1c   :  { %463 = vmatprep.subr.bf16.mxu1 %v462_v28  ;;  %v504_v41 = vpack.c.bf16 %v70_v38, %v65_v37  ;;  %v53_v42 = vld [vmem:[#allocation2 + $0xa0] sm:$0xff]  ;;  %v58_v43 = vld [vmem:[#allocation2 + $0xc8] sm:$0xff]  ;;  %v506_v44 = vpack.c.bf16 %v81_v40, %v76_v39  ;;  %v64_v45 = vld [vmem:[#allocation2 + $0xf8] sm:$0xff]  ;;  %v593_v40 = vmov 0.0  }
  0x1d   :  { %v69_v46 = vld [vmem:[#allocation2 + $0x120] sm:$0xff]  ;;  %v468_v47 = vpack.c.bf16 %v58_v43, %v53_v42  ;;  %v29_v48 = vld [vmem:[%s670_s0 + $0x8] sm:$0xff]  ;;  %v75_v50 = vld [vmem:[#allocation2 + $0x150] sm:$0xff] }
  0x1e   :  { %497 = vmatpush1.bf16.xpose.msra.mxu0 %v496_v13  ;;  %v470_v49 = vpack.c.bf16 %v69_v46, %v64_v45  ;;  %236 = vmatprep.mubr.f32.mxu1 %v29_v48  ;;  %v80_v51 = vld [vmem:[#allocation2 + $0x178] sm:$0xff]  ;;  %v86_v52 = vld [vmem:[#allocation2 + $0x1a8] sm:$0xff]  ;;  %v91_v53 = vld [vmem:[#allocation2 + $0x1d0] sm:$0xff] }
  0x1f   :  { %499 = vmatprep.subr.bf16.mxu0 %v498_v14  ;;  %v508_v54 = vpack.c.bf16 %v80_v51, %v75_v50  ;;  %v63_v55 = vld [vmem:[#allocation2 + $0xf0] sm:$0xff]  ;;  %v68_v56 = vld [vmem:[#allocation2 + $0x118] sm:$0xff]  ;;  %v510_v57 = vpack.c.bf16 %v91_v53, %v86_v52  ;;  %v74_v58 = vld [vmem:[#allocation2 + $0x148] sm:$0xff] }
  0x20   :  { %v79_v59 = vld [vmem:[#allocation2 + $0x170] sm:$0xff]  ;;  %v472_v60 = vpack.c.bf16 %v68_v56, %v63_v55  ;;  %v85_v62 = vld [vmem:[#allocation2 + $0x1a0] sm:$0xff]  ;;  %v90_v63 = vld [vmem:[#allocation2 + $0x1c8] sm:$0xff] }
  0x21   :  { %v474_v61 = vpack.c.bf16 %v79_v59, %v74_v58  ;;  %v96_v0 = vld [vmem:[#allocation2 + $0x1f8] sm:$0xff]  ;;  %v101_v1 = vld [vmem:[#allocation2 + $0x220] sm:$0xff]  ;;  %v512_v2 = vpack.c.bf16 %v90_v63, %v85_v62  ;;  %v78_v4 = vld [vmem:[#allocation2 + $0x168] sm:$0xff] }
  0x22   :  { %465 = vmatpush1.bf16.xpose.msra.mxu1 %v464_v35  ;;  %v73_v3 = vld [vmem:[#allocation2 + $0x140] sm:$0xff]  ;;  %v514_v5 = vpack.c.bf16 %v101_v1, %v96_v0  ;;  %v84_v6 = vld [vmem:[#allocation2 + $0x198] sm:$0xff]  ;;  %v95_v10 = vld [vmem:[#allocation2 + $0x1f0] sm:$0xff] }
  0x23   :  { %467 = vmatprep.subr.bf16.mxu1 %v466_v36  ;;  %v89_v7 = vld [vmem:[#allocation2 + $0x1c0] sm:$0xff]  ;;  %v476_v8 = vpack.c.bf16 %v78_v4, %v73_v3  ;;  %v100_v11 = vld [vmem:[#allocation2 + $0x218] sm:$0xff]  ;;  %v106_v12 = vld [vmem:[#allocation2 + $0x248] sm:$0xff] }
  0x24   :  { %v478_v9 = vpack.c.bf16 %v89_v7, %v84_v6  ;;  %v111_v13 = vld [vmem:[#allocation2 + $0x270] sm:$0xff]  ;;  %v516_v14 = vpack.c.bf16 %v100_v11, %v95_v10  ;;  %v88_v16 = vld [vmem:[#allocation2 + $0x1b8] sm:$0xff]  ;;  %v94_v18 = vld [vmem:[#allocation2 + $0x1e8] sm:$0xff] }
  0x25   :  { %v83_v15 = vld [vmem:[#allocation2 + $0x190] sm:$0xff]  ;;  %v518_v17 = vpack.c.bf16 %v111_v13, %v106_v12  ;;  %v105_v22 = vld [vmem:[#allocation2 + $0x240] sm:$0xff]  ;;  %v110_v23 = vld [vmem:[#allocation2 + $0x268] sm:$0xff] }
  0x26   :  { %501 = vmatpush1.bf16.xpose.msra.mxu0 %v500_v29  ;;  %v99_v19 = vld [vmem:[#allocation2 + $0x210] sm:$0xff]  ;;  %v480_v20 = vpack.c.bf16 %v88_v16, %v83_v15  ;;  %v520_v24 = vpack.c.bf16 %v110_v23, %v105_v22  ;;  %v93_v25 = vld [vmem:[#allocation2 + $0x1e0] sm:$0xff]  ;;  %v98_v26 = vld [vmem:[#allocation2 + $0x208] sm:$0xff] }
  0x27   :  { %503 = vmatprep.subr.bf16.mxu0 %v502_v32  ;;  %v482_v21 = vpack.c.bf16 %v99_v19, %v94_v18  ;;  %v104_v27 = vld [vmem:[#allocation2 + $0x238] sm:$0xff]  ;;  %v109_v28 = vld [vmem:[#allocation2 + $0x260] sm:$0xff]  ;;  %v484_v29 = vpack.c.bf16 %v98_v26, %v93_v25  ;;  %v42_v33 = vld [vmem:[#allocation2 + $0x48] sm:$0xff] }
  0x28   :  { %v486_v30 = vpack.c.bf16 %v109_v28, %v104_v27  ;;  %v37_v32 = vld [vmem:[#allocation2 + $0x20] sm:$0xff]  ;;  %v30_v34 = vld [vmem:[%s670_s0 + $0x10] sm:$0xff]  ;;  %v108_v37 = vld [vmem:[#allocation2 + $0x258] sm:$0xff] }
  0x29   :  { %v523_v35 = vpack.c.bf16 %v42_v33, %v37_v32  ;;  %v103_v36 = vld [vmem:[#allocation2 + $0x230] sm:$0xff]  ;;  %vm637_vm1 = vmpackc.low %vm120_vm0, %vm120_vm0  ;;  %v52_v42 = vld [vmem:[#allocation2 + $0x98] sm:$0xff] }
  0x2a   :  { %469 = vmatpush1.bf16.xpose.msra.mxu1 %v468_v47  ;;  %v488_v39 = vpack.c.bf16 %v108_v37, %v103_v36  ;;  %v57_v45 = vld [vmem:[#allocation2 + $0xc0] sm:$0xff]  ;;  %v62_v46 = vld [vmem:[#allocation2 + $0xe8] sm:$0xff]  ;;  %v67_v48 = vld [vmem:[#allocation2 + $0x110] sm:$0xff] }
  0x2b   :  { %471 = vmatprep.subr.bf16.mxu1 %v470_v49  ;;  %v531_v47 = vpack.c.bf16 %v62_v46, %v57_v45  ;;  %v72_v49 = vld [vmem:[#allocation2 + $0x138] sm:$0xff]  ;;  %v77_v51 = vld [vmem:[#allocation2 + $0x160] sm:$0xff]  ;;  %v82_v52 = vld [vmem:[#allocation2 + $0x188] sm:$0xff] }
  0x2c   :  { %v535_v50 = vpack.c.bf16 %v72_v49, %v67_v48  ;;  %v539_v53 = vpack.c.bf16 %v82_v52, %v77_v51  ;;  %v92_v55 = vld [vmem:[#allocation2 + $0x1d8] sm:$0xff]  ;;  %v102_v58 = vld [vmem:[#allocation2 + $0x228] sm:$0xff]  ;;  %v32_v63 = vld [vmem:[%s670_s0 + $0x20] sm:$0xff] }
  0x2e   :  { %505 = vmatpush1.bf16.xpose.msra.mxu0 %v504_v41  ;;  %v47_v41 = vld [vmem:[#allocation2 + $0x70] sm:$0xff] }
  0x2f   :  { %507 = vmatprep.subr.bf16.mxu0 %v506_v44  ;;  %v527_v43 = vpack.c.bf16 %v52_v42, %v47_v41  ;;  %v28_v44 = vld [vmem:[%s670_s0] sm:$0xff] }
  0x32   :  { %473 = vmatpush1.bf16.xpose.msra.mxu1 %v472_v60  ;;  %v107_v60 = vld [vmem:[#allocation2 + $0x250] sm:$0xff] }
  0x33   :  { %475 = vmatprep.subr.bf16.mxu1 %v474_v61  ;;  %v112_v61 = vld [vmem:[#allocation2 + $0x278] sm:$0xff] }
  0x34   :  { %v551_v62 = vpack.c.bf16 %v112_v61, %v107_v60 }
  0x36   :  { %509 = vmatpush1.bf16.xpose.msra.mxu0 %v508_v54  ;;  %v87_v54 = vld [vmem:[#allocation2 + $0x1b0] sm:$0xff] }
  0x37   :  { %511 = vmatprep.subr.bf16.mxu0 %v510_v57  ;;  %v543_v56 = vpack.c.bf16 %v92_v55, %v87_v54  ;;  %v97_v57 = vld [vmem:[#allocation2 + $0x200] sm:$0xff] }
  0x38   :  { %v547_v59 = vpack.c.bf16 %v102_v58, %v97_v57 }
  0x3a   :  { %477 = vmatpush1.bf16.xpose.msra.mxu1 %v476_v8 }
  0x3b   :  { %479 = vmatprep.subr.bf16.mxu1 %v478_v9 }
  0x3e   :  { %513 = vmatpush1.bf16.xpose.msra.mxu0 %v512_v2  ;;  %v388_v2 = vld [vmem:[%s672_s2] ss:$0 sm:$0xff] }
  0x3f   :  { %515 = vmatprep.subr.bf16.mxu0 %v514_v5 }
  0x42   :  { %481 = vmatpush1.bf16.xpose.msra.mxu1 %v480_v20 }
  0x43   :  { %483 = vmatprep.subr.bf16.mxu1 %v482_v21 }
  0x46   :  { %517 = vmatpush1.bf16.xpose.msra.mxu0 %v516_v14 }
  0x47   :  { %519 = vmatprep.subr.bf16.mxu0 %v518_v17 }
  0x4a   :  { %485 = vmatpush1.bf16.xpose.msra.mxu1 %v484_v29 }
  0x4b   :  { %487 = vmatprep.subr.bf16.mxu1 %v486_v30 }
  0x4e   :  { %521 = vmatpush1.bf16.xpose.msra.mxu0 %v520_v24 }
  0x4f   :  { %522 = vmatprep.subr.bf16.mxu0 %v591_v31 }
  0x52   :  { %489 = vmatpush1.bf16.xpose.msra.mxu1 %v488_v39 }
  0x55   :  { %307 = vmatmul.mubr.f32.vlgmr.msra.gmra.mrb[0].mxu0 %v30_v34 }
  0x56   :  { %525 = vmatpush3.bf16.xpose.msk.msra.mxu0 %vm637_vm1, %v523_v35  ;;  %455 = vmatprep.mubr.msk.f32.mxu0 %vm592_vm2, %v593_v40 }
  0x57   :  { %526 = vmatprep.subr.bf16.mxu0 %v591_v31 }
  0x59   :  { %237 = vmatmul.mubr.f32.vlgmr.msra.gmra.mrb[0].mxu1 %v28_v44 }
  0x5e   :  { %529 = vmatpush3.bf16.xpose.msk.msra.mxu0 %vm637_vm1, %v527_v43 }
  0x5f   :  { %530 = vmatprep.subr.bf16.mxu0 %v591_v31 }
  0x66   :  { %533 = vmatpush3.bf16.xpose.msk.msra.mxu0 %vm637_vm1, %v531_v47 }
  0x67   :  { %534 = vmatprep.subr.bf16.mxu0 %v591_v31 }
  0x6e   :  { %537 = vmatpush3.bf16.xpose.msk.msra.mxu0 %vm637_vm1, %v535_v50 }
  0x6f   :  { %538 = vmatprep.subr.bf16.mxu0 %v591_v31 }
  0x76   :  { %541 = vmatpush3.bf16.xpose.msk.msra.mxu0 %vm637_vm1, %v539_v53 }
  0x77   :  { %542 = vmatprep.subr.bf16.mxu0 %v591_v31 }
  0x7e   :  { %545 = vmatpush3.bf16.xpose.msk.msra.mxu0 %vm637_vm1, %v543_v56 }
  0x7f   :  { %546 = vmatprep.subr.bf16.mxu0 %v591_v31 }
  0x86   :  { %549 = vmatpush3.bf16.xpose.msk.msra.mxu0 %vm637_vm1, %v547_v59 }
  0x87   :  { %550 = vmatprep.subr.bf16.mxu0 %v591_v31 }
  0x8e   :  { %553 = vmatpush3.bf16.xpose.msk.msra.mxu0 %vm637_vm1, %v551_v62 }
  0x95   :  { %456 = vmatmul.mubr.msk.f32.vlgmr.msra.gmra.mrb[0].mxu0 %vm120_vm0, %v32_v63 }
 0x12c   :  { %v238_v0 = vpop.f32.mrb[0].mxu1 }
 0x12d   :  { %v240_v1 = vpop.f32.mrb[1].mxu1  ;;  %v239_v3 = vadd.f32 %v388_v2, %v238_v0 }
 0x168   :  { %v378_v4 = vpop.f32.mrb[0].mxu0 }
 0x169   :  { %v555_v5 = vadd.f32 %v378_v4, %v239_v3  ;;  %v457_v6 = vpop.f32.mrb[1].mxu0 }
 0x16b   :  { %382 = vst [vmem:[%s673_s3] sm:$0xff] %v555_v5 }
 0x16c   :  { %387 = vsyncpa [#allocation3], 1 }

</bundles_post_ra>
